<compile_context>
chip_gen: v5e
topology: v5e:2x2
jax: 0.10.0
libtpu: 0.0.40
codegen_flags: <defaults>
</compile_context>

<pallas_src>
import functools

import jax
import jax.numpy as jnp
from jax.experimental import pallas as pl
from jax.experimental.pallas import tpu as pltpu

NEG_SLOPE = 0.01   # F.leaky_relu default
LANE = 128


def _round_up(v, m):
    return ((v + m - 1) // m) * m


def _leaky_relu(x):
    return jnp.where(x > 0, x, NEG_SLOPE * x)


# ----------------------------------------------------------------------------------------------
# Generation-aware knobs
# ----------------------------------------------------------------------------------------------
def _tpu_vmem_capacity():
    try:
        info = pltpu.get_tpu_info()
        cap = getattr(info, "vmem_capacity_bytes", None)
        if cap:
            return int(cap)
    except Exception:
        pass
    return 64 << 20   # conservative fallback (v7x per-TC VMEM)


def _tile_target():
    # 128-MiB-VMEM chips (v5e/v6e) can afford bigger dst-row tiles than 64-MiB chips (v7x).
    return 512 if _tpu_vmem_capacity() >= (96 << 20) else 256


def _vmem_limit(*block_bytes):
    need = 2 * int(sum(int(b) for b in block_bytes)) + (2 << 20)   # double-buffered + headroom
    hi = max(32 << 20, _tpu_vmem_capacity() - (8 << 20))           # never ask for all of VMEM
    return int(min(hi, max(32 << 20, need)))


def _pick_tile(n, target):
    """Destination-row tile (multiple of 8) and padded node count (multiple of the tile)."""
    tile = _round_up(min(int(target), max(int(n), 8)), 8)
    n_pad = _round_up(max(int(n), tile), tile)
    return tile, n_pad


# ----------------------------------------------------------------------------------------------
# Kernels
# ----------------------------------------------------------------------------------------------
def _conv_agg_kernel(adj_ref, xf_ref, wr_ref, wn_ref, b_ref, o_ref, *, tile):
    """GraphConv, aggregate-then-transform (Fout >= Fin).

      adj_ref : [T, NP]  bf16  adjacency rows for this dst tile (adj[dst, src])
      xf_ref  : [NP, F]  bf16  full node features (constant index map -> fetched once)
      wr_ref  : [F, O]   bf16  root weights
      wn_ref  : [F, O]   bf16  rel  weights
      b_ref   : [1, O]   f32   bias
      o_ref   : [T, O]   bf16  leaky_relu(GraphConv(x))
    """
    rows = pl.ds(pl.multiple_of(pl.program_id(0) * tile, tile), tile)
    agg = jnp.dot(adj_ref[...], xf_ref[...], preferred_element_type=jnp.float32)   # [T, F]
    out = jnp.dot(xf_ref[rows, :], wr_ref[...], preferred_element_type=jnp.float32)
    out = out + jnp.dot(agg.astype(jnp.bfloat16), wn_ref[...],
                        preferred_element_type=jnp.float32)
    out = out + b_ref[...]
    o_ref[...] = _leaky_relu(out).astype(o_ref.dtype)


def _conv_pre_kernel(adj_ref, xrel_ref, xroot_ref, b_ref, o_ref, *, tile):
    """GraphConv with pre-transformed operands (conv1, enc_conv1):

      out = root_pre[rows] + adj_tile @ rel_pre + b

      adj_ref   : [T, NP] bf16
      xrel_ref  : [NP, O] bf16  (X @ W_rel^T, hoisted / gathered host-side)
      xroot_ref : [NP, O] bf16  (X @ W_root^T)
      b_ref     : [1, O]  f32
      o_ref     : [T, O]  bf16
    """
    rows = pl.ds(pl.multiple_of(pl.program_id(0) * tile, tile), tile)
    agg = jnp.dot(adj_ref[...], xrel_ref[...], preferred_element_type=jnp.float32)  # [T, O]
    out = xroot_ref[rows, :].astype(jnp.float32) + agg + b_ref[...]
    o_ref[...] = _leaky_relu(out).astype(o_ref.dtype)


def _dual_matmul_kernel(x_ref, wa_ref, wb_ref, oa_ref, ob_ref):
    """Row-tiled X @ Wa, X @ Wb (hoists enc_conv1's transform out of the per-tile loop)."""
    x = x_ref[...]
    oa_ref[...] = jnp.dot(x, wa_ref[...], preferred_element_type=jnp.float32).astype(oa_ref.dtype)
    ob_ref[...] = jnp.dot(x, wb_ref[...], preferred_element_type=jnp.float32).astype(ob_ref.dtype)


def _pool_head_kernel(member_ref, lat_ref, invc_ref, wl_ref, bl_ref, o_ref, acc_ref):
    """global_mean_pool + linear head, tiled over nodes with an f32 VMEM accumulator."""
    @pl.when(pl.program_id(0) == 0)
    def _():
        acc_ref[...] = jnp.zeros_like(acc_ref)

    acc_ref[...] += jnp.dot(member_ref[...], lat_ref[...], preferred_element_type=jnp.float32)

    @pl.when(pl.program_id(0) == pl.num_programs(0) - 1)
    def _():
        pooled = acc_ref[...] * invc_ref[...]                       # exact mean (0/1 * 1/count)
        o_ref[...] = jnp.dot(pooled, wl_ref[...], preferred_element_type=jnp.float32) + bl_ref[...]


# ----------------------------------------------------------------------------------------------
# pallas_call wrappers
# ----------------------------------------------------------------------------------------------
def _run_conv_agg(adj, x, wr, wn, b, tile):
    NP = adj.shape[0]
    F = x.shape[1]
    O = wr.shape[1]
    cost = pl.CostEstimate(
        flops=int(2 * NP * NP * F + 4 * NP * F * O),
        transcendentals=0,
        bytes_accessed=int(NP * NP * 2 + NP * F * 2 + 2 * F * O * 2 + NP * O * 2 + O * 4),
    )
    cparams = pltpu.CompilerParams(
        dimension_semantics=("parallel",),
        vmem_limit_bytes=_vmem_limit(tile * NP * 2, NP * F * 2, 2 * F * O * 2,
                                     O * 4, tile * O * 2),
    )
    return pl.pallas_call(
        functools.partial(_conv_agg_kernel, tile=tile),
        out_shape=jax.ShapeDtypeStruct((NP, O), jnp.bfloat16),
        grid=(NP // tile,),
        in_specs=[
            pl.BlockSpec((tile, NP), lambda i: (i, 0)),     # adjacency rows (pipelined)
            pl.BlockSpec((NP, F), lambda i: (0, 0)),        # resident full x (bf16)
            pl.BlockSpec((F, O), lambda i: (0, 0)),         # W_root
            pl.BlockSpec((F, O), lambda i: (0, 0)),         # W_rel
            pl.BlockSpec((1, O), lambda i: (0, 0)),         # bias
        ],
        out_specs=pl.BlockSpec((tile, O), lambda i: (i, 0)),
        compiler_params=cparams,
        cost_estimate=cost,
    )(adj, x, wr, wn, b)


def _run_conv_pre(adj, xrel, xroot, b, tile):
    NP = adj.shape[0]
    O = xrel.shape[1]
    cost = pl.CostEstimate(
        flops=int(2 * NP * NP * O),
        transcendentals=0,
        bytes_accessed=int(NP * NP * 2 + 2 * NP * O * 2 + NP * O * 2 + O * 4),
    )
    cparams = pltpu.CompilerParams(
        dimension_semantics=("parallel",),
        vmem_limit_bytes=_vmem_limit(tile * NP * 2, 2 * NP * O * 2, O * 4, tile * O * 2),
    )
    return pl.pallas_call(
        functools.partial(_conv_pre_kernel, tile=tile),
        out_shape=jax.ShapeDtypeStruct((NP, O), jnp.bfloat16),
        grid=(NP // tile,),
        in_specs=[
            pl.BlockSpec((tile, NP), lambda i: (i, 0)),
            pl.BlockSpec((NP, O), lambda i: (0, 0)),        # pre-transformed rel source
            pl.BlockSpec((NP, O), lambda i: (0, 0)),        # pre-transformed root contribution
            pl.BlockSpec((1, O), lambda i: (0, 0)),
        ],
        out_specs=pl.BlockSpec((tile, O), lambda i: (i, 0)),
        compiler_params=cparams,
        cost_estimate=cost,
    )(adj, xrel, xroot, b)


def _run_dual_matmul(x, wa, wb, tile):
    NP, F = x.shape
    O = wa.shape[1]
    cparams = pltpu.CompilerParams(
        dimension_semantics=("parallel",),
        vmem_limit_bytes=_vmem_limit(tile * F * 2, 2 * F * O * 2, 2 * tile * O * 2),
    )
    return pl.pallas_call(
        _dual_matmul_kernel,
        out_shape=(jax.ShapeDtypeStruct((NP, O), jnp.bfloat16),
                   jax.ShapeDtypeStruct((NP, O), jnp.bfloat16)),
        grid=(NP // tile,),
        in_specs=[
            pl.BlockSpec((tile, F), lambda i: (i, 0)),
            pl.BlockSpec((F, O), lambda i: (0, 0)),
            pl.BlockSpec((F, O), lambda i: (0, 0)),
        ],
        out_specs=(pl.BlockSpec((tile, O), lambda i: (i, 0)),
                   pl.BlockSpec((tile, O), lambda i: (i, 0))),
        compiler_params=cparams,
    )(x, wa, wb)


def _run_pool_head(member, lat, inv_counts, wl, bl, tile):
    G, NP = member.shape
    LATP = lat.shape[1]
    OUTP = wl.shape[1]
    cparams = pltpu.CompilerParams(
        dimension_semantics=("arbitrary",),     # accumulator carried across the node axis
        vmem_limit_bytes=_vmem_limit(G * tile * 2, tile * LATP * 2, G * 4,
                                     LATP * OUTP * 4, OUTP * 4, G * OUTP * 4, G * LATP * 4),
    )
    return pl.pallas_call(
        _pool_head_kernel,
        out_shape=jax.ShapeDtypeStruct((G, OUTP), jnp.float32),
        grid=(NP // tile,),
        in_specs=[
            pl.BlockSpec((G, tile), lambda i: (0, i)),       # 0/1 membership columns
            pl.BlockSpec((tile, LATP), lambda i: (i, 0)),    # latent rows
            pl.BlockSpec((G, 1), lambda i: (0, 0)),          # 1/|graph|
            pl.BlockSpec((LATP, OUTP), lambda i: (0, 0)),    # head weight (f32, tiny)
            pl.BlockSpec((1, OUTP), lambda i: (0, 0)),       # head bias
        ],
        out_specs=pl.BlockSpec((G, OUTP), lambda i: (0, 0)),
        scratch_shapes=[pltpu.VMEM((G, LATP), jnp.float32)],
        compiler_params=cparams,
    )(member, lat, inv_counts, wl, bl)


# ----------------------------------------------------------------------------------------------
# Parameters
# ----------------------------------------------------------------------------------------------
def init_params(key, hidden_channels, num_node_labels=10, output_dim=7, embedding_dim=3):
    """Deterministic parameter init; weights stored transposed as [Fin, Fout]."""
    dims = [
        ("emb", (num_node_labels, embedding_dim)),
        ("w1r", (embedding_dim, hidden_channels)),
        ("w1n", (embedding_dim, hidden_channels)),
        ("b1", (1, hidden_channels)),
        ("w2r", (hidden_channels, hidden_channels * 16)),
        ("w2n", (hidden_channels, hidden_channels * 16)),
        ("b2", (1, hidden_channels * 16)),
        ("w3r", (hidden_channels * 16, hidden_channels * 4)),
        ("w3n", (hidden_channels * 16, hidden_channels * 4)),
        ("b3", (1, hidden_channels * 4)),
        ("w4r", (hidden_channels * 4, hidden_channels * 16)),
        ("w4n", (hidden_channels * 4, hidden_channels * 16)),
        ("b4", (1, hidden_channels * 16)),
        ("wl", (hidden_channels * 4, output_dim)),
        ("bl", (1, output_dim)),
    ]
    params = {}
    keys = jax.random.split(key, len(dims))
    for k, (name, shape) in zip(keys, dims):
        bound = 1.0 / jnp.sqrt(jnp.float32(shape[0]))
        params[name] = jax.random.uniform(k, shape, jnp.float32, -bound, bound)
    return params


def _pack_params(params, hidden_channels, num_node_labels, output_dim):
    """Fold embedding into per-label conv1 tables, zero-pad feature dims to 128-lane multiples
    (exact padding), cast MXU weights to bf16, keep biases / head in f32."""
    H = hidden_channels
    HP = _round_up(H, LANE)
    F2P = _round_up(16 * H, LANE)
    LATP = _round_up(4 * H, LANE)
    OUTP = _round_up(output_dim, LANE)

    def pad2(a, rows, cols, dtype=jnp.float32):
        out = jnp.zeros((rows, cols), jnp.float32).at[:a.shape[0], :a.shape[1]].set(a)
        return out.astype(dtype)

    bf16 = jnp.bfloat16
    # conv1: one_hot @ (emb @ W) == (emb @ W)[labels]  ->  gathered host-side, no one-hot matmul.
    r1_tab = pad2(params["emb"] @ params["w1r"], num_node_labels, HP)   # [L, HP] f32
    n1_tab = pad2(params["emb"] @ params["w1n"], num_node_labels, HP)
    return {
        "r1_tab": r1_tab, "n1_tab": n1_tab, "b1": pad2(params["b1"], 1, HP),
        "w2r": pad2(params["w2r"], HP, F2P, bf16), "w2n": pad2(params["w2n"], HP, F2P, bf16),
        "b2": pad2(params["b2"], 1, F2P),
        "w3r": pad2(params["w3r"], F2P, LATP, bf16), "w3n": pad2(params["w3n"], F2P, LATP, bf16),
        "b3": pad2(params["b3"], 1, LATP),
        "w4r": pad2(params["w4r"], LATP, F2P, bf16), "w4n": pad2(params["w4n"], LATP, F2P, bf16),
        "b4": pad2(params["b4"], 1, F2P),
        "wl": pad2(params["wl"], LATP, OUTP), "bl": pad2(params["bl"], 1, OUTP),
    }


# ----------------------------------------------------------------------------------------------
# Forward
# ----------------------------------------------------------------------------------------------
def gnn_autoencoder_forward(x, edge_index, batch, params, *, hidden_channels,
                            num_node_labels=10, output_dim=7, num_graphs=None):
    """x: [N, 1] float node labels; edge_index: [2, E] int32; batch: [N] int32 graph ids."""
    if num_graphs is None:
        # int(jnp.max(batch)) would force a host sync and break under jit; require it statically.
        raise ValueError("num_graphs must be passed statically")
    N = x.shape[0]
    H = hidden_channels
    G = num_graphs

    tile, NP = _pick_tile(N, _tile_target())
    packed = _pack_params(params, H, num_node_labels, output_dim)

    # --- plain-JAX glue: label gather, dense adjacency scatter, membership / counts, padding ---
    labels = x.astype(jnp.int32).squeeze(-1)                               # [N]

    def pad_rows_bf16(a):
        return jnp.zeros((NP, a.shape[1]), jnp.float32).at[:a.shape[0]].set(a).astype(jnp.bfloat16)

    root1 = pad_rows_bf16(packed["r1_tab"][labels])                        # [NP, HP] bf16
    rel1 = pad_rows_bf16(packed["n1_tab"][labels])                         # [NP, HP] bf16

    src, dst = edge_index[0], edge_index[1]
    # TODO(synk): for realistically sized sparse graphs, skip the dense NP x NP adjacency and
    # use a block-sparse / CSR edge gather (PrefetchScalarGridSpec + manual DMA) instead.
    adj = jnp.zeros((NP, NP), jnp.float32).at[dst, src].add(1.0)           # adj[dst, src]
    adj = adj.astype(jnp.bfloat16)   # exact while per-pair edge multiplicity <= 256

    batch_p = jnp.full((NP,), -1, jnp.int32).at[:N].set(batch)
    graph_ids = jnp.arange(G, dtype=jnp.int32)
    member_f32 = (batch_p[None, :] == graph_ids[:, None]).astype(jnp.float32)     # [G, NP]
    inv_counts = 1.0 / jnp.maximum(member_f32.sum(axis=1, keepdims=True), 1.0)    # [G, 1] f32
    member = member_f32.astype(jnp.bfloat16)                                      # 0/1 exact

    # --- Pallas layers (bf16 activations, f32 accumulation) ---
    # conv1 (embedding folded into gathered tables)                           [NP, HP]
    h1 = _run_conv_pre(adj, rel1, root1, packed["b1"], tile)
    # conv2 -> original_node_features                                         [NP, F2P]
    orig = _run_conv_agg(adj, h1, packed["w2r"], packed["w2n"], packed["b2"], tile)
    # enc_conv1 (Fout < Fin): hoist X@W once, then A @ (X@W_rel) per tile     [NP, LATP]
    root3, rel3 = _run_dual_matmul(orig, packed["w3r"], packed["w3n"], tile)
    lat = _run_conv_pre(adj, rel3, root3, packed["b3"], tile)
    # dec_conv1 -> reconstructed_features                                     [NP, F2P]
    recon = _run_conv_agg(adj, lat, packed["w4r"], packed["w4n"], packed["b4"], tile)
    # global_mean_pool + linear head                                          [G, OUTP]
    logits = _run_pool_head(member, lat, inv_counts, packed["wl"], packed["bl"], tile)

    return {
        "graph_logits": logits[:, :output_dim],
        "reconstructed_features": recon[:N, :16 * H].astype(jnp.float32),
        "original_node_features": orig[:N, :16 * H].astype(jnp.float32),
    }


# ----------------------------------------------------------------------------------------------
# Pure-JAX f32 reference (loose sanity check; kernels use bf16 weights/activations on the MXU)
# ----------------------------------------------------------------------------------------------
def _reference_forward(x, edge_index, batch, params, num_graphs):
    node_labels = x.astype(jnp.int32).squeeze(-1)
    h = params["emb"][node_labels]
    N = x.shape[0]
    adj = jnp.zeros((N, N), jnp.float32).at[edge_index[1], edge_index[0]].add(1.0)

    def conv(v, wr, wn, b):
        return v @ wr + (adj @ v) @ wn + b

    h1 = _leaky_relu(conv(h, params["w1r"], params["w1n"], params["b1"]))
    orig = _leaky_relu(conv(h1, params["w2r"], params["w2n"], params["b2"]))
    lat = _leaky_relu(conv(orig, params["w3r"], params["w3n"], params["b3"]))
    member = (batch[None, :] == jnp.arange(num_graphs, dtype=jnp.int32)[:, None]).astype(jnp.float32)
    pool = member / jnp.maximum(member.sum(axis=1, keepdims=True), 1.0)
    logits = pool @ lat @ params["wl"] + params["bl"]
    recon = _leaky_relu(conv(lat, params["w4r"], params["w4n"], params["b4"]))
    return {"graph_logits": logits, "reconstructed_features": recon,
            "original_node_features": orig}


if __name__ == "__main__":
    hidden_channels = 8
    num_node_labels = 10
    output_dim = 7
    embedding_dim = 3

    N = 16          # total nodes across both graphs
    G = 2           # number of graphs
    E = 32          # number of directed edges

    key = jax.random.PRNGKey(0)
    k_params, k_labels, k_src, k_dst = jax.random.split(key, 4)

    params = init_params(k_params, hidden_channels, num_node_labels, output_dim, embedding_dim)

    # Node labels as float [N, 1] (mirrors torch x.long().squeeze(-1))
    x = jax.random.randint(k_labels, (N, 1), 0, num_node_labels).astype(jnp.float32)

    # batch: first 8 nodes -> graph 0, last 8 -> graph 1
    batch = jnp.concatenate([jnp.zeros(8, jnp.int32), jnp.ones(8, jnp.int32)])

    # Edges kept within each graph: half in [0,8), half in [8,16)
    src0 = jax.random.randint(k_src, (E // 2,), 0, 8)
    dst0 = jax.random.randint(k_dst, (E // 2,), 0, 8)
    src1 = jax.random.randint(jax.random.fold_in(k_src, 1), (E // 2,), 8, 16)
    dst1 = jax.random.randint(jax.random.fold_in(k_dst, 1), (E // 2,), 8, 16)
    edge_index = jnp.stack(
        [jnp.concatenate([src0, src1]), jnp.concatenate([dst0, dst1])]
    ).astype(jnp.int32)

    out = gnn_autoencoder_forward(
        x, edge_index, batch, params,
        hidden_channels=hidden_channels,
        num_node_labels=num_node_labels,
        output_dim=output_dim,
        num_graphs=G,
    )
    jax.block_until_ready(out)

    assert out["graph_logits"].shape == (G, output_dim)
    assert out["reconstructed_features"].shape == (N, 16 * hidden_channels)
    assert out["original_node_features"].shape == (N, 16 * hidden_channels)
    for v in out.values():
        assert bool(jnp.all(jnp.isfinite(v)))

    # Loose sanity check vs. an f32 reference (kernels use bf16 operands / activations).
    ref = _reference_forward(x, edge_index, batch, params, G)
    for name in out:
        scale = jnp.maximum(jnp.max(jnp.abs(ref[name])), 1e-3)
        rel = float(jnp.max(jnp.abs(out[name] - ref[name])) / scale)
        assert rel < 0.15, f"{name}: relative error {rel:.4f} too large"

    print("KERNEL_OK")
</pallas_src>

<mosaic_0001>
module attributes {stable_mosaic.version = 11 : i64} {
  func.func @_conv_pre_kernel(%arg0: i32, %arg1: memref<16x16xbf16, #tpu.memory_space<vmem>>, %arg2: memref<16x128xbf16, #tpu.memory_space<vmem>>, %arg3: memref<16x128xbf16, #tpu.memory_space<vmem>>, %arg4: memref<1x128xf32, #tpu.memory_space<vmem>>, %arg5: memref<16x128xbf16, #tpu.memory_space<vmem>>) attributes {dimension_semantics = [#tpu.dimension_semantics<parallel>], iteration_bounds = array<i64: 1>, scalar_prefetch = 0 : i64, scratch_operands = 0 : i64, tpu.core_type = #tpu.core_type<tc>, window_params = [{transform_indices = @transform_0, window_bounds = array<i64: 16, 16>}, {pipeline_mode = #tpu.pipeline_mode<synchronous>, transform_indices = @transform_1, window_bounds = array<i64: 16, 128>}, {pipeline_mode = #tpu.pipeline_mode<synchronous>, transform_indices = @transform_2, window_bounds = array<i64: 16, 128>}, {pipeline_mode = #tpu.pipeline_mode<synchronous>, transform_indices = @transform_3, window_bounds = array<i64: 1, 128>}, {transform_indices = @transform_4, window_bounds = array<i64: 16, 128>}]} {
    %c16_i32 = arith.constant 16 : i32
    %0 = arith.muli %arg0, %c16_i32 : i32
    %1 = tpu.assume_multiple %0, 16 : i32
    %c0 = arith.constant 0 : index
    %c0_0 = arith.constant 0 : index
    %2 = vector.load %arg1[%c0, %c0_0] : memref<16x16xbf16, #tpu.memory_space<vmem>>, vector<16x16xbf16>
    %c0_1 = arith.constant 0 : index
    %c0_2 = arith.constant 0 : index
    %3 = vector.load %arg2[%c0_1, %c0_2] : memref<16x128xbf16, #tpu.memory_space<vmem>>, vector<16x128xbf16>
    %cst = arith.constant dense<0.000000e+00> : vector<16x128xf32>
    %4 = tpu.matmul %2, %3, %cst {dimension_numbers = #tpu.dot_dimension_numbers<[1], [0], [0], [1], [0, 0, 1, 1], [], []>} : vector<16x16xbf16>, vector<16x128xbf16>, vector<16x128xf32> -> vector<16x128xf32>
    %5 = arith.index_cast %1 : i32 to index
    %c0_3 = arith.constant 0 : index
    %6 = vector.load %arg3[%5, %c0_3] : memref<16x128xbf16, #tpu.memory_space<vmem>>, vector<16x128xbf16>
    %7 = arith.extf %6 : vector<16x128xbf16> to vector<16x128xf32>
    %8 = arith.addf %7, %4 : vector<16x128xf32>
    %c0_4 = arith.constant 0 : index
    %c0_5 = arith.constant 0 : index
    %9 = vector.load %arg4[%c0_4, %c0_5] : memref<1x128xf32, #tpu.memory_space<vmem>>, vector<1x128xf32>
    %10 = vector.broadcast %9 : vector<1x128xf32> to vector<16x128xf32>
    %11 = arith.addf %8, %10 : vector<16x128xf32>
    %cst_6 = arith.constant 0.000000e+00 : f32
    %12 = vector.broadcast %cst_6 : f32 to vector<16x128xf32>
    %13 = arith.cmpf ogt, %11, %12 : vector<16x128xf32>
    %cst_7 = arith.constant 0.00999999977 : f32
    %14 = vector.broadcast %cst_7 : f32 to vector<16x128xf32>
    %15 = arith.mulf %14, %11 : vector<16x128xf32>
    %16 = arith.select %13, %11, %15 : vector<16x128xi1>, vector<16x128xf32>
    %17 = arith.truncf %16 : vector<16x128xf32> to vector<16x128xbf16>
    %c0_8 = arith.constant 0 : index
    %c0_9 = arith.constant 0 : index
    %18 = vector.load %arg5[%c0_8, %c0_9] : memref<16x128xbf16, #tpu.memory_space<vmem>>, vector<16x128xbf16>
    tpu.vector_store %arg5[%c0_8, %c0_9], %17 {strides = array<i32>} : memref<16x128xbf16, #tpu.memory_space<vmem>>, vector<16x128xbf16>,
    return
  }
  func.func @transform_0(%arg0: i32) -> (i32, i32) {
    %c0_i32 = arith.constant 0 : i32
    %c0_i32_0 = arith.constant 0 : i32
    return %arg0, %c0_i32 : i32, i32
  }
  func.func @transform_1(%arg0: i32) -> (i32, i32) {
    %c0_i32 = arith.constant 0 : i32
    %c0_i32_0 = arith.constant 0 : i32
    %c0_i32_1 = arith.constant 0 : i32
    return %c0_i32, %c0_i32_0 : i32, i32
  }
  func.func @transform_2(%arg0: i32) -> (i32, i32) {
    %c0_i32 = arith.constant 0 : i32
    %c0_i32_0 = arith.constant 0 : i32
    %c0_i32_1 = arith.constant 0 : i32
    return %c0_i32, %c0_i32_0 : i32, i32
  }
  func.func @transform_3(%arg0: i32) -> (i32, i32) {
    %c0_i32 = arith.constant 0 : i32
    %c0_i32_0 = arith.constant 0 : i32
    %c0_i32_1 = arith.constant 0 : i32
    return %c0_i32, %c0_i32_0 : i32, i32
  }
  func.func @transform_4(%arg0: i32) -> (i32, i32) {
    %c0_i32 = arith.constant 0 : i32
    %c0_i32_0 = arith.constant 0 : i32
    return %arg0, %c0_i32 : i32, i32
  }
}

</mosaic_0001>

<bundles_post_ra>
// kernel: tpu_custom_call.1
= control target key start
LH: loop header
LB: loop body
LE: loop exit
PB: predicated region body
PF: predicated region fallthrough
CT: control target
= control target key end

     0   :  { %9 = vsyncpa [#allocation3], 0  ;;  %s335_s0 = inlined_call_operand.hbm [shape: bf16[16,16], index: 0, kind: input, shape index: {}]   ;;  %s336_s1 = inlined_call_operand.hbm [shape: bf16[16,128], index: 1, kind: input, shape index: {}]   ;;  %s337_s2 = inlined_call_operand.hbm [shape: bf16[16,128], index: 2, kind: input, shape index: {}]   ;;  %s338_s3 = inlined_call_operand.vmem [shape: f32[1,128], index: 3, kind: input, shape index: {}]   ;;  %s339_s4 = inlined_call_operand.hbm [shape: bf16[16,128], index: 4, kind: output, shape index: {}]  }
   0x1   :  { %10 = vsyncpa [#allocation6], 0 }
   0x2   :  { %11 = vsyncpa [#allocation4], 0  ;;  %s29_s17 = sshll.u32 %s336_s1, 4  ;;  %s277_s18 = smov [#allocation5]   ;;  %s30_s17 = int_to_ptr.hbm [resolvable:$true] %s29_s17 }
   0x3   :  { %s31_s19 = sshll.u32 %s277_s18, 4  ;;  %s16_s22 = sshll.u32 %s335_s0, 4  ;;  %s32_s19 = int_to_ptr.vmem [resolvable:$true] %s31_s19  ;;  %s17_s22 = int_to_ptr.hbm [resolvable:$true] %s16_s22 }
   0x4   :  { %s278_s23 = smov 64   ;;  %s279_s24 = smov 4  }
   0x5   :  { %37 = dma.hbm_to_vmem [thread:$0]  %s30_s17, 128, %s32_s19, [#allocation6], %s278_s23, %s278_s23, %s279_s24  }
   0x6   :  { %s280_s25 = smov [#allocation2]   ;;  %s42_s1 = sshll.u32 %s337_s2, 4  ;;  %s43_s1 = int_to_ptr.hbm [resolvable:$true] %s42_s1 }
   0x7   :  { %s18_s26 = sshll.u32 %s280_s25, 4  ;;  %s281_s0 = smov [#allocation7]   ;;  %s19_s26 = int_to_ptr.vmem [resolvable:$true] %s18_s26 }
   0x8   :  { %24 = dma.hbm_to_vmem [thread:$0]  %s17_s22, 128, %s19_s26, [#allocation3], %s278_s23, %s278_s23, %s279_s24  }
   0x9   :  { %s44_s29 = sshll.u32 %s281_s0, 4  ;;  %s45_s29 = int_to_ptr.vmem [resolvable:$true] %s44_s29 }
   0xa   :  { %50 = dma.hbm_to_vmem [thread:$0]  %s43_s1, 128, %s45_s29, [#allocation6], %s278_s23, %s278_s23, %s279_s24  }
   0xb   :  { %271 = dma.done.wait [#allocation3], 128  }
   0xc   :  { %272 = vsyncadd [#allocation3], 4294967168 }
   0xd   :  { %273 = dma.done.wait [#allocation6], 256  }
   0xe   :  { %274 = vsyncadd [#allocation6], 4294967040  ;;  %v158_v0 = vld [vmem:[#allocation5] sm:$0xff]  ;;  %v157_v1 = vld [vmem:[#allocation2] sm:$0xff]  ;;  %vm82_vm0 = vcmask 130048   ;;  %s282_s5 = smov [#allocation8]  }
   0xf   :  { %93 = vmatpush.bf16.msra.mxu0 %v158_v0  ;;  %v160_v2 = vld [vmem:[#allocation7] sm:$0xff]   ;;  %v174_v6 = vld [vmem:[%s338_s3] ss:$0 sm:$0xff]  ;;  %s130_s6 = sshll.u32 %s282_s5, 4  ;;  %s132_s9 = sshll.u32 %s339_s4, 4  ;;  %s131_s6 = int_to_ptr.vmem [resolvable:$true] %s130_s6  ;;  %s133_s9 = int_to_ptr.hbm [resolvable:$true] %s132_s9 }
  0x10   :  { %v161_v3 = vunpack.c.l.bf16 %v160_v2  ;;  %v162_v7 = vunpack.c.h.bf16 %v160_v2 }
  0x12   :  { %156 = vmatmul.msk.bf16.vlgmr.msra.gmra.mxu0 %vm82_vm0, %v157_v1 }
  0x8f   :  { %v95_v4 = vpop.f32.mrf.mxu0 }
  0x90   :  { %v108_v5 = vadd.f32 %v161_v3, %v95_v4 }
  0x92   :  { %v114_v8 = vadd.f32 %v174_v6, %v108_v5 }
  0x94   :  { %v118_v11 = vmul.f32 0.01, %v114_v8  ;;  %vm116_vm1 = vcmp.gt.f32.partialorder %v114_v8, 0.0 }
  0x96   :  { %v120_v14 = vsel %vm116_vm1, %v114_v8, %v118_v11 }
  0x97   :  { %v97_v9 = vpop.f32.mrf.mxu0 }
  0x98   :  { %v109_v10 = vadd.f32 %v162_v7, %v97_v9 }
  0x9a   :  { %v115_v12 = vadd.f32 %v174_v6, %v109_v10 }
  0x9c   :  { %vm117_vm2 = vcmp.gt.f32.partialorder %v115_v12, 0.0  ;;  %v119_v13 = vmul.f32 0.01, %v115_v12 }
  0x9e   :  { %v121_v15 = vsel %vm117_vm2, %v115_v12, %v119_v13 }
  0x9f   :  { %v166_v16 = vpack.c.bf16 %v121_v15, %v120_v14 }
  0xa1   :  { %167 = vst [vmem:[#allocation8] sm:$0xff] %v166_v16  }
  0xa2   :  { %138 = dma.vmem_to_hbm [thread:$0]  %s131_s6, 128, %s133_s9, [#allocation4], %s278_s23, %s278_s23, %s279_s24  }
  0xa3   :  { %275 = dma.done.wait [#allocation4], 128  }
  0xa4   :  { %276 = vsyncadd [#allocation4], 4294967168 }
  0xa5   :  { %143 = vsyncpa [#allocation3], 1 }
  0xa6   :  { %144 = vsyncpa [#allocation6], 1 }
  0xa7   :  { %145 = vsyncpa [#allocation4], 1 }

</bundles_post_ra>
